<compile_context>
chip_gen: v7x
topology: tpu7x:2x2x1
jax: 0.10.0
libtpu: 0.0.40
codegen_flags: <defaults>
</compile_context>

<pallas_src>
import jax
import jax.numpy as jnp
from jax.experimental import pallas as pl
from jax.experimental.pallas import tpu as pltpu

QUERY_DIM = 1024
HIDDEN_DIM = 128
NUM_CLASSES = 2
DEFAULT_BLOCK_B = 512  # batch tile (rows); keeps >=2 grid steps once B >= 1024


def _round_up(x, m):
    return ((x + m - 1) // m) * m


def armodel_kernel(x_ref,
                   w1_ref, b1_ref,
                   w2_ref, b2_ref,
                   w3_ref, b3_ref,
                   w4_ref, b4_ref,
                   w5_ref, b5_ref,
                   o_ref):
    # x / weights are bf16 (MXU-native); accumulate & post-process in f32.
    h = jnp.dot(x_ref[...], w1_ref[...], preferred_element_type=jnp.float32) + b1_ref[...]
    h = jnp.maximum(h, 0.0).astype(jnp.bfloat16)
    h = jnp.dot(h, w2_ref[...], preferred_element_type=jnp.float32) + b2_ref[...]
    h = jnp.maximum(h, 0.0).astype(jnp.bfloat16)
    h = jnp.dot(h, w3_ref[...], preferred_element_type=jnp.float32) + b3_ref[...]
    h = jnp.maximum(h, 0.0).astype(jnp.bfloat16)
    h = jnp.dot(h, w4_ref[...], preferred_element_type=jnp.float32) + b4_ref[...]
    h = jnp.maximum(h, 0.0).astype(jnp.bfloat16)
    logits = jnp.dot(h, w5_ref[...], preferred_element_type=jnp.float32) + b5_ref[...]

    # Numerically stable log_softmax over the 2-class axis (f32 throughout).
    m = jnp.max(logits, axis=1, keepdims=True)
    shifted = logits - m
    lse = jnp.log(jnp.sum(jnp.exp(shifted), axis=1, keepdims=True))
    o_ref[...] = (shifted - lse).astype(o_ref.dtype)


def prepare_params(params):
    """Cast weights to bf16 once (MXU feed); keep biases f32, shaped (1, out)."""
    flat = []
    for (w, b) in params:
        flat.append(w.astype(jnp.bfloat16))
        flat.append(b.astype(jnp.float32).reshape(1, -1))
    return flat


def armodel_forward(x, flat_params, *, block_b=DEFAULT_BLOCK_B):
    """x: (B, QUERY_DIM) f32 or bf16. flat_params from prepare_params.

    Returns (B, NUM_CLASSES) f32 log-probabilities.
    """
    B, Q = x.shape
    assert Q == QUERY_DIM

    if x.dtype != jnp.bfloat16:
        x = x.astype(jnp.bfloat16)  # halves the activation HBM stream

    # Adaptive batch tile; pad ragged batches instead of asserting divisibility.
    tb = min(block_b, _round_up(B, 8))
    b_pad = _round_up(B, tb)
    if b_pad != B:
        x = jnp.pad(x, ((0, b_pad - B), (0, 0)))

    grid = (b_pad // tb,)

    def const_spec(shape):
        zeros = (0,) * len(shape)
        return pl.BlockSpec(shape, lambda i, _z=zeros: _z)  # parameter resident in VMEM

    in_specs = [pl.BlockSpec((tb, Q), lambda i: (i, 0))]  # x batch tile
    for p in flat_params:
        in_specs.append(const_spec(p.shape))
    out_spec = pl.BlockSpec((tb, NUM_CLASSES), lambda i: (i, 0))

    param_bytes = sum(int(p.size) * p.dtype.itemsize for p in flat_params)
    flops = 2 * b_pad * (QUERY_DIM * HIDDEN_DIM
                         + 3 * HIDDEN_DIM * HIDDEN_DIM
                         + HIDDEN_DIM * NUM_CLASSES)
    cost = pl.CostEstimate(
        flops=flops,
        transcendentals=b_pad * (NUM_CLASSES + 1),       # exp per class + log
        bytes_accessed=(b_pad * QUERY_DIM * 2            # bf16 activations in
                        + param_bytes                    # weights/biases
                        + b_pad * NUM_CLASSES * 4))      # f32 log-probs out

    out = pl.pallas_call(
        armodel_kernel,
        out_shape=jax.ShapeDtypeStruct((b_pad, NUM_CLASSES), jnp.float32),
        grid_spec=pltpu.PrefetchScalarGridSpec(
            num_scalar_prefetch=0,
            grid=grid,
            in_specs=in_specs,
            out_specs=out_spec,
        ),
        compiler_params=pltpu.CompilerParams(
            dimension_semantics=("parallel",),  # batch tiles shard across TCs
        ),
        cost_estimate=cost,
    )(x, *flat_params)

    return out[:B]


def init_params(key):
    """Deterministic init matching nn.Linear shapes.

    Weights stored as (in_features, out_features); biases as (1, out_features).
    """
    dims = [(QUERY_DIM, HIDDEN_DIM),
            (HIDDEN_DIM, HIDDEN_DIM),
            (HIDDEN_DIM, HIDDEN_DIM),
            (HIDDEN_DIM, HIDDEN_DIM),
            (HIDDEN_DIM, NUM_CLASSES)]
    params = []
    for (fan_in, fan_out) in dims:
        key, kw, kb = jax.random.split(key, 3)
        bound = 1.0 / jnp.sqrt(fan_in)
        w = jax.random.uniform(kw, (fan_in, fan_out), jnp.float32, -bound, bound)
        b = jax.random.uniform(kb, (1, fan_out), jnp.float32, -bound, bound)
        params.append((w, b))
    return params


def reference_forward_f32(x, params):
    h = x
    for (w, b) in params[:-1]:
        h = jnp.maximum(h @ w + b, 0.0)
    logits = h @ params[-1][0] + params[-1][1]
    return jax.nn.log_softmax(logits, axis=1)


def reference_forward_bf16(x, params):
    # Mirrors the kernel's mixed precision: bf16 MXU inputs, f32 accumulation.
    h = x.astype(jnp.bfloat16)
    for (w, b) in params[:-1]:
        h = jnp.dot(h, w.astype(jnp.bfloat16), preferred_element_type=jnp.float32) + b
        h = jnp.maximum(h, 0.0).astype(jnp.bfloat16)
    logits = jnp.dot(h, params[-1][0].astype(jnp.bfloat16),
                     preferred_element_type=jnp.float32) + params[-1][1]
    return jax.nn.log_softmax(logits, axis=1)


if __name__ == "__main__":
    key = jax.random.PRNGKey(0)
    key, kx1, kx2 = jax.random.split(key, 3)
    params = init_params(key)
    flat_params = prepare_params(params)

    # Small batch (shapes implied by the module: inputs are (B, 1024)).
    B_small = 8
    x_small = jax.random.normal(kx1, (B_small, QUERY_DIM), jnp.float32)
    out_small = jax.block_until_ready(armodel_forward(x_small, flat_params))
    assert out_small.shape == (B_small, NUM_CLASSES)
    assert jnp.allclose(out_small, reference_forward_bf16(x_small, params),
                        atol=5e-3, rtol=5e-3), "mismatch vs bf16 reference"
    assert jnp.allclose(out_small, reference_forward_f32(x_small, params),
                        atol=8e-2, rtol=0.0), "mismatch vs f32 reference"

    # Ragged multi-tile batch: exercises the 512-row tile, zero padding, and
    # >= 2 parallel grid steps (both v7x TensorCores active).
    B_big = 1000
    x_big = jax.random.normal(kx2, (B_big, QUERY_DIM), jnp.float32)
    out_big = jax.block_until_ready(armodel_forward(x_big, flat_params))
    assert out_big.shape == (B_big, NUM_CLASSES)
    assert jnp.allclose(out_big, reference_forward_bf16(x_big, params),
                        atol=5e-3, rtol=5e-3), "mismatch vs bf16 reference (big batch)"
    assert bool(jnp.all(jnp.isfinite(out_big)))

    print("KERNEL_OK")
</pallas_src>

<mosaic_0001>
module attributes {stable_mosaic.version = 11 : i64} {
  func.func @armodel_kernel(%arg0: i32, %arg1: memref<8x1024xbf16, #tpu.memory_space<vmem>>, %arg2: memref<1024x128xbf16, #tpu.memory_space<vmem>>, %arg3: memref<1x128xf32, #tpu.memory_space<vmem>>, %arg4: memref<128x128xbf16, #tpu.memory_space<vmem>>, %arg5: memref<1x128xf32, #tpu.memory_space<vmem>>, %arg6: memref<128x128xbf16, #tpu.memory_space<vmem>>, %arg7: memref<1x128xf32, #tpu.memory_space<vmem>>, %arg8: memref<128x128xbf16, #tpu.memory_space<vmem>>, %arg9: memref<1x128xf32, #tpu.memory_space<vmem>>, %arg10: memref<128x2xbf16, #tpu.memory_space<vmem>>, %arg11: memref<1x2xf32, #tpu.memory_space<vmem>>, %arg12: memref<8x2xf32, #tpu.memory_space<vmem>>) attributes {dimension_semantics = [#tpu.dimension_semantics<parallel>], iteration_bounds = array<i64: 1>, scalar_prefetch = 0 : i64, scratch_operands = 0 : i64, tpu.core_type = #tpu.core_type<tc>, window_params = [{transform_indices = @transform_0, window_bounds = array<i64: 8, 1024>}, {pipeline_mode = #tpu.pipeline_mode<synchronous>, transform_indices = @transform_1, window_bounds = array<i64: 1024, 128>}, {pipeline_mode = #tpu.pipeline_mode<synchronous>, transform_indices = @transform_2, window_bounds = array<i64: 1, 128>}, {pipeline_mode = #tpu.pipeline_mode<synchronous>, transform_indices = @transform_3, window_bounds = array<i64: 128, 128>}, {pipeline_mode = #tpu.pipeline_mode<synchronous>, transform_indices = @transform_4, window_bounds = array<i64: 1, 128>}, {pipeline_mode = #tpu.pipeline_mode<synchronous>, transform_indices = @transform_5, window_bounds = array<i64: 128, 128>}, {pipeline_mode = #tpu.pipeline_mode<synchronous>, transform_indices = @transform_6, window_bounds = array<i64: 1, 128>}, {pipeline_mode = #tpu.pipeline_mode<synchronous>, transform_indices = @transform_7, window_bounds = array<i64: 128, 128>}, {pipeline_mode = #tpu.pipeline_mode<synchronous>, transform_indices = @transform_8, window_bounds = array<i64: 1, 128>}, {pipeline_mode = #tpu.pipeline_mode<synchronous>, transform_indices = @transform_9, window_bounds = array<i64: 128, 2>}, {pipeline_mode = #tpu.pipeline_mode<synchronous>, transform_indices = @transform_10, window_bounds = array<i64: 1, 2>}, {transform_indices = @transform_11, window_bounds = array<i64: 8, 2>}]} {
    %c0 = arith.constant 0 : index
    %c0_0 = arith.constant 0 : index
    %0 = vector.load %arg1[%c0, %c0_0] : memref<8x1024xbf16, #tpu.memory_space<vmem>>, vector<8x1024xbf16>
    %c0_1 = arith.constant 0 : index
    %c0_2 = arith.constant 0 : index
    %1 = vector.load %arg2[%c0_1, %c0_2] : memref<1024x128xbf16, #tpu.memory_space<vmem>>, vector<1024x128xbf16>
    %cst = arith.constant dense<0.000000e+00> : vector<8x128xf32>
    %2 = tpu.matmul %0, %1, %cst {dimension_numbers = #tpu.dot_dimension_numbers<[1], [0], [0], [1], [0, 0, 1, 1], [], []>} : vector<8x1024xbf16>, vector<1024x128xbf16>, vector<8x128xf32> -> vector<8x128xf32>
    %c0_3 = arith.constant 0 : index
    %c0_4 = arith.constant 0 : index
    %3 = vector.load %arg3[%c0_3, %c0_4] : memref<1x128xf32, #tpu.memory_space<vmem>>, vector<1x128xf32>
    %4 = vector.broadcast %3 : vector<1x128xf32> to vector<8x128xf32>
    %5 = arith.addf %2, %4 : vector<8x128xf32>
    %cst_5 = arith.constant 0.000000e+00 : f32
    %6 = vector.broadcast %cst_5 : f32 to vector<8x128xf32>
    %7 = arith.maximumf %5, %6 : vector<8x128xf32>
    %8 = arith.truncf %7 : vector<8x128xf32> to vector<8x128xbf16>
    %c0_6 = arith.constant 0 : index
    %c0_7 = arith.constant 0 : index
    %9 = vector.load %arg4[%c0_6, %c0_7] : memref<128x128xbf16, #tpu.memory_space<vmem>>, vector<128x128xbf16>
    %cst_8 = arith.constant dense<0.000000e+00> : vector<8x128xf32>
    %10 = tpu.matmul %8, %9, %cst_8 {dimension_numbers = #tpu.dot_dimension_numbers<[1], [0], [0], [1], [0, 0, 1, 1], [], []>} : vector<8x128xbf16>, vector<128x128xbf16>, vector<8x128xf32> -> vector<8x128xf32>
    %c0_9 = arith.constant 0 : index
    %c0_10 = arith.constant 0 : index
    %11 = vector.load %arg5[%c0_9, %c0_10] : memref<1x128xf32, #tpu.memory_space<vmem>>, vector<1x128xf32>
    %12 = vector.broadcast %11 : vector<1x128xf32> to vector<8x128xf32>
    %13 = arith.addf %10, %12 : vector<8x128xf32>
    %cst_11 = arith.constant 0.000000e+00 : f32
    %14 = vector.broadcast %cst_11 : f32 to vector<8x128xf32>
    %15 = arith.maximumf %13, %14 : vector<8x128xf32>
    %16 = arith.truncf %15 : vector<8x128xf32> to vector<8x128xbf16>
    %c0_12 = arith.constant 0 : index
    %c0_13 = arith.constant 0 : index
    %17 = vector.load %arg6[%c0_12, %c0_13] : memref<128x128xbf16, #tpu.memory_space<vmem>>, vector<128x128xbf16>
    %cst_14 = arith.constant dense<0.000000e+00> : vector<8x128xf32>
    %18 = tpu.matmul %16, %17, %cst_14 {dimension_numbers = #tpu.dot_dimension_numbers<[1], [0], [0], [1], [0, 0, 1, 1], [], []>} : vector<8x128xbf16>, vector<128x128xbf16>, vector<8x128xf32> -> vector<8x128xf32>
    %c0_15 = arith.constant 0 : index
    %c0_16 = arith.constant 0 : index
    %19 = vector.load %arg7[%c0_15, %c0_16] : memref<1x128xf32, #tpu.memory_space<vmem>>, vector<1x128xf32>
    %20 = vector.broadcast %19 : vector<1x128xf32> to vector<8x128xf32>
    %21 = arith.addf %18, %20 : vector<8x128xf32>
    %cst_17 = arith.constant 0.000000e+00 : f32
    %22 = vector.broadcast %cst_17 : f32 to vector<8x128xf32>
    %23 = arith.maximumf %21, %22 : vector<8x128xf32>
    %24 = arith.truncf %23 : vector<8x128xf32> to vector<8x128xbf16>
    %c0_18 = arith.constant 0 : index
    %c0_19 = arith.constant 0 : index
    %25 = vector.load %arg8[%c0_18, %c0_19] : memref<128x128xbf16, #tpu.memory_space<vmem>>, vector<128x128xbf16>
    %cst_20 = arith.constant dense<0.000000e+00> : vector<8x128xf32>
    %26 = tpu.matmul %24, %25, %cst_20 {dimension_numbers = #tpu.dot_dimension_numbers<[1], [0], [0], [1], [0, 0, 1, 1], [], []>} : vector<8x128xbf16>, vector<128x128xbf16>, vector<8x128xf32> -> vector<8x128xf32>
    %c0_21 = arith.constant 0 : index
    %c0_22 = arith.constant 0 : index
    %27 = vector.load %arg9[%c0_21, %c0_22] : memref<1x128xf32, #tpu.memory_space<vmem>>, vector<1x128xf32>
    %28 = vector.broadcast %27 : vector<1x128xf32> to vector<8x128xf32>
    %29 = arith.addf %26, %28 : vector<8x128xf32>
    %cst_23 = arith.constant 0.000000e+00 : f32
    %30 = vector.broadcast %cst_23 : f32 to vector<8x128xf32>
    %31 = arith.maximumf %29, %30 : vector<8x128xf32>
    %32 = arith.truncf %31 : vector<8x128xf32> to vector<8x128xbf16>
    %c0_24 = arith.constant 0 : index
    %c0_25 = arith.constant 0 : index
    %33 = vector.load %arg10[%c0_24, %c0_25] : memref<128x2xbf16, #tpu.memory_space<vmem>>, vector<128x2xbf16>
    %cst_26 = arith.constant dense<0.000000e+00> : vector<8x2xf32>
    %34 = tpu.matmul %32, %33, %cst_26 {dimension_numbers = #tpu.dot_dimension_numbers<[1], [0], [0], [1], [0, 0, 1, 1], [], []>} : vector<8x128xbf16>, vector<128x2xbf16>, vector<8x2xf32> -> vector<8x2xf32>
    %c0_27 = arith.constant 0 : index
    %c0_28 = arith.constant 0 : index
    %35 = vector.load %arg11[%c0_27, %c0_28] : memref<1x2xf32, #tpu.memory_space<vmem>>, vector<1x2xf32>
    %36 = vector.broadcast %35 : vector<1x2xf32> to vector<8x2xf32>
    %37 = arith.addf %34, %36 : vector<8x2xf32>
    %cst_29 = arith.constant dense<0xFF800000> : vector<8xf32>
    %38 = vector.multi_reduction <maximumf>, %37, %cst_29 [1] : vector<8x2xf32> to vector<8xf32>
    %39 = vector.shape_cast %38 : vector<8xf32> to vector<8x1xf32>
    %40 = vector.broadcast %39 : vector<8x1xf32> to vector<8x2xf32>
    %41 = arith.subf %37, %40 : vector<8x2xf32>
    %42 = math.exp %41 : vector<8x2xf32>
    %cst_30 = arith.constant dense<0.000000e+00> : vector<8xf32>
    %43 = vector.multi_reduction <add>, %42, %cst_30 [1] : vector<8x2xf32> to vector<8xf32>
    %44 = vector.shape_cast %43 : vector<8xf32> to vector<8x1xf32>
    %45 = math.log %44 : vector<8x1xf32>
    %46 = vector.broadcast %45 : vector<8x1xf32> to vector<8x2xf32>
    %47 = arith.subf %41, %46 : vector<8x2xf32>
    %c0_31 = arith.constant 0 : index
    %c0_32 = arith.constant 0 : index
    %48 = vector.load %arg12[%c0_31, %c0_32] : memref<8x2xf32, #tpu.memory_space<vmem>>, vector<8x2xf32>
    tpu.vector_store %arg12[%c0_31, %c0_32], %47 {strides = array<i32>} : memref<8x2xf32, #tpu.memory_space<vmem>>, vector<8x2xf32>,
    return
  }
  func.func @transform_0(%arg0: i32) -> (i32, i32) {
    %c0_i32 = arith.constant 0 : i32
    %c0_i32_0 = arith.constant 0 : i32
    return %arg0, %c0_i32 : i32, i32
  }
  func.func @transform_1(%arg0: i32) -> (i32, i32) {
    %c0_i32 = arith.constant 0 : i32
    %c0_i32_0 = arith.constant 0 : i32
    %c0_i32_1 = arith.constant 0 : i32
    return %c0_i32, %c0_i32_0 : i32, i32
  }
  func.func @transform_2(%arg0: i32) -> (i32, i32) {
    %c0_i32 = arith.constant 0 : i32
    %c0_i32_0 = arith.constant 0 : i32
    %c0_i32_1 = arith.constant 0 : i32
    return %c0_i32, %c0_i32_0 : i32, i32
  }
  func.func @transform_3(%arg0: i32) -> (i32, i32) {
    %c0_i32 = arith.constant 0 : i32
    %c0_i32_0 = arith.constant 0 : i32
    %c0_i32_1 = arith.constant 0 : i32
    return %c0_i32, %c0_i32_0 : i32, i32
  }
  func.func @transform_4(%arg0: i32) -> (i32, i32) {
    %c0_i32 = arith.constant 0 : i32
    %c0_i32_0 = arith.constant 0 : i32
    %c0_i32_1 = arith.constant 0 : i32
    return %c0_i32, %c0_i32_0 : i32, i32
  }
  func.func @transform_5(%arg0: i32) -> (i32, i32) {
    %c0_i32 = arith.constant 0 : i32
    %c0_i32_0 = arith.constant 0 : i32
    %c0_i32_1 = arith.constant 0 : i32
    return %c0_i32, %c0_i32_0 : i32, i32
  }
  func.func @transform_6(%arg0: i32) -> (i32, i32) {
    %c0_i32 = arith.constant 0 : i32
    %c0_i32_0 = arith.constant 0 : i32
    %c0_i32_1 = arith.constant 0 : i32
    return %c0_i32, %c0_i32_0 : i32, i32
  }
  func.func @transform_7(%arg0: i32) -> (i32, i32) {
    %c0_i32 = arith.constant 0 : i32
    %c0_i32_0 = arith.constant 0 : i32
    %c0_i32_1 = arith.constant 0 : i32
    return %c0_i32, %c0_i32_0 : i32, i32
  }
  func.func @transform_8(%arg0: i32) -> (i32, i32) {
    %c0_i32 = arith.constant 0 : i32
    %c0_i32_0 = arith.constant 0 : i32
    %c0_i32_1 = arith.constant 0 : i32
    return %c0_i32, %c0_i32_0 : i32, i32
  }
  func.func @transform_9(%arg0: i32) -> (i32, i32) {
    %c0_i32 = arith.constant 0 : i32
    %c0_i32_0 = arith.constant 0 : i32
    %c0_i32_1 = arith.constant 0 : i32
    return %c0_i32, %c0_i32_0 : i32, i32
  }
  func.func @transform_10(%arg0: i32) -> (i32, i32) {
    %c0_i32 = arith.constant 0 : i32
    %c0_i32_0 = arith.constant 0 : i32
    %c0_i32_1 = arith.constant 0 : i32
    return %c0_i32, %c0_i32_0 : i32, i32
  }
  func.func @transform_11(%arg0: i32) -> (i32, i32) {
    %c0_i32 = arith.constant 0 : i32
    %c0_i32_0 = arith.constant 0 : i32
    return %arg0, %c0_i32 : i32, i32
  }
}

</mosaic_0001>

<bundles_post_ra>
// kernel: tpu_custom_call.1
= control target key start
LH: loop header
LB: loop body
LE: loop exit
PB: predicated region body
PF: predicated region fallthrough
CT: control target
= control target key end

     0   :  { %16 = vsyncpa [#allocation3], 0  ;;  %s2033_s0 = inlined_call_operand.hbm [shape: bf16[8,1024], index: 0, kind: input, shape index: {}]   ;;  %s2034_s1 = inlined_call_operand.hbm [shape: bf16[1024,128], index: 1, kind: input, shape index: {}]   ;;  %s2035_s2 = inlined_call_operand.vmem [shape: f32[1,128], index: 2, kind: input, shape index: {}]   ;;  %s2036_s3 = inlined_call_operand.vmem [shape: bf16[128,128], index: 3, kind: input, shape index: {}]   ;;  %s2037_s4 = inlined_call_operand.vmem [shape: f32[1,128], index: 4, kind: input, shape index: {}]   ;;  %s2038_s5 = inlined_call_operand.hbm [shape: bf16[128,128], index: 5, kind: input, shape index: {}]   ;;  %s2039_s6 = inlined_call_operand.vmem [shape: f32[1,128], index: 6, kind: input, shape index: {}]   ;;  %s2040_s7 = inlined_call_operand.hbm [shape: bf16[128,128], index: 7, kind: input, shape index: {}]   ;;  %s2041_s8 = inlined_call_operand.vmem [shape: f32[1,128], index: 8, kind: input, shape index: {}]   ;;  %s2042_s9 = inlined_call_operand.vmem [shape: bf16[128,2], index: 9, kind: input, shape index: {}]   ;;  %s2043_s10 = inlined_call_operand.vmem [shape: f32[1,2], index: 10, kind: input, shape index: {}]   ;;  %s2044_s11 = inlined_call_operand.vmem [shape: f32[8,2], index: 11, kind: output, shape index: {}]  }
   0x1   :  { %17 = vsyncpa [#allocation5], 0 }
   0x2   :  { %18 = vsyncpa [#allocation8], 0  ;;  %s1799_s17 = smov [#allocation4]   ;;  %s1705_s21 = scalar_lea.hbm %s2034_s1, 8192 }
   0x3   :  { %s34_s18 = sshll.u32 %s1799_s17, 4  ;;  %p1706_p0 = scmp.ne.s32.totalorder %s2034_s1, %s1705_s21  ;;  %s35_s18 = int_to_ptr.vmem [resolvable:$true] %s34_s18 }
   0x4   :  { %p1709_p1 = scmp.lt.u32.totalorder %s1705_s21, %s2034_s1 }
   0x6   :  { %p1711_p2 = pnand %p1709_p1, %p1706_p0 }
   0x8   :  { %1714 = shalt.err (!%p1711_p2)
}
   0x9   :  { %s1715_s26 = scalar_lea.vmem %s35_s18, 8192  ;;  %p1720_p4 = scmp.lt.s32.totalorder %s35_s18, %s35_s18 }
   0xa   :  { %p1716_p3 = scmp.ne.s32.totalorder %s35_s18, %s1715_s26  ;;  %p1721_p5 = scmp.lt.s32.totalorder %s1715_s26, %s1715_s26 }
   0xc   :  { %p1722_p6 = por %p1721_p5, %p1720_p4 }
   0xe   :  { %p1723_p7 = pnand %p1722_p6, %p1716_p3 }
  0x10   :  { %1726 = shalt.err (!%p1723_p7)
}
  0x11   :  { %s1800_s27 = smov 64   ;;  %s1801_s28 = smov 4  }
  0x12   :  { %40 = dma.hbm_to_vmem [thread:$0]  %s2034_s1, 8192, %s35_s18, [#allocation5], %s1800_s27, %s1800_s27, %s1801_s28  }
  0x13   :  { %s1802_s12 = smov [#allocation2]   ;;  %s1803_s14 = smov [#allocation6]  }
  0x14   :  { %s25_s13 = sshll.u32 %s1802_s12, 4  ;;  %s52_s15 = sshll.u32 %s1803_s14, 4  ;;  %s26_s13 = int_to_ptr.vmem [resolvable:$true] %s25_s13  ;;  %s53_s15 = int_to_ptr.vmem [resolvable:$true] %s52_s15 }
  0x15   :  { %s1727_s19 = scalar_lea.hbm %s2033_s0, 512 }
  0x16   :  { %p1728_p8 = scmp.ne.s32.totalorder %s2033_s0, %s1727_s19  ;;  %p1731_p9 = scmp.lt.u32.totalorder %s1727_s19, %s2033_s0 }
  0x18   :  { %p1733_p10 = pnand %p1731_p9, %p1728_p8 }
  0x1a   :  { %1736 = shalt.err (!%p1733_p10)
}
  0x1b   :  { %s1737_s1 = scalar_lea.vmem %s26_s13, 512  ;;  %p1742_p12 = scmp.lt.s32.totalorder %s26_s13, %s26_s13 }
  0x1c   :  { %p1738_p11 = scmp.ne.s32.totalorder %s26_s13, %s1737_s1  ;;  %p1743_p13 = scmp.lt.s32.totalorder %s1737_s1, %s1737_s1 }
  0x1e   :  { %p1744_p0 = por %p1743_p13, %p1742_p12 }
  0x20   :  { %p1745_p1 = pnand %p1744_p0, %p1738_p11 }
  0x22   :  { %1748 = shalt.err (!%p1745_p1)
}
  0x23   :  { %28 = dma.hbm_to_vmem [thread:$0]  %s2033_s0, 512, %s26_s13, [#allocation3]  }
  0x24   :  { %s1749_s29 = scalar_lea.hbm %s2038_s5, 1024 }
  0x25   :  { %p1750_p2 = scmp.ne.s32.totalorder %s2038_s5, %s1749_s29  ;;  %p1753_p3 = scmp.lt.u32.totalorder %s1749_s29, %s2038_s5 }
  0x27   :  { %p1755_p4 = pnand %p1753_p3, %p1750_p2 }
  0x29   :  { %1758 = shalt.err (!%p1755_p4)
}
  0x2a   :  { %s1759_s17 = scalar_lea.vmem %s53_s15, 1024  ;;  %p1764_p6 = scmp.lt.s32.totalorder %s53_s15, %s53_s15 }
  0x2b   :  { %p1760_p5 = scmp.ne.s32.totalorder %s53_s15, %s1759_s17  ;;  %p1765_p7 = scmp.lt.s32.totalorder %s1759_s17, %s1759_s17 }
  0x2d   :  { %p1766_p8 = por %p1765_p7, %p1764_p6 }
  0x2f   :  { %p1767_p9 = pnand %p1766_p8, %p1760_p5 }
  0x31   :  { %1770 = shalt.err (!%p1767_p9)
}
  0x32   :  { %58 = dma.hbm_to_vmem [thread:$0]  %s2038_s5, 1024, %s53_s15, [#allocation5], %s1800_s27, %s1800_s27, %s1801_s28  }
  0x33   :  { %s1804_s19 = smov [#allocation7]   ;;  %s1771_s23 = scalar_lea.hbm %s2040_s7, 1024 }
  0x34   :  { %s66_s20 = sshll.u32 %s1804_s19, 4  ;;  %p1772_p10 = scmp.ne.s32.totalorder %s2040_s7, %s1771_s23  ;;  %s67_s20 = int_to_ptr.vmem [resolvable:$true] %s66_s20 }
  0x35   :  { %p1775_p11 = scmp.lt.u32.totalorder %s1771_s23, %s2040_s7 }
  0x37   :  { %p1777_p12 = pnand %p1775_p11, %p1772_p10 }
  0x39   :  { %1780 = shalt.err (!%p1777_p12)
}
  0x3a   :  { %s1781_s26 = scalar_lea.vmem %s67_s20, 1024  ;;  %p1786_p0 = scmp.lt.s32.totalorder %s67_s20, %s67_s20 }
  0x3b   :  { %p1782_p13 = scmp.ne.s32.totalorder %s67_s20, %s1781_s26  ;;  %p1787_p1 = scmp.lt.s32.totalorder %s1781_s26, %s1781_s26 }
  0x3d   :  { %p1788_p2 = por %p1787_p1, %p1786_p0 }
  0x3f   :  { %p1789_p3 = pnand %p1788_p2, %p1782_p13 }
  0x41   :  { %1792 = shalt.err (!%p1789_p3)
}
  0x42   :  { %72 = dma.hbm_to_vmem [thread:$0]  %s2040_s7, 1024, %s67_s20, [#allocation8], %s1800_s27, %s1800_s27, %s1801_s28  }
  0x43   :  { %1793 = dma.done.wait [#allocation3], 512  }
  0x44   :  { %1794 = vsyncadd [#allocation3], 4294966784 }
  0x45   :  { %1795 = dma.done.wait [#allocation5], 9216  }
  0x46   :  { %1796 = vsyncadd [#allocation5], 4294958080 }
  0x47   :  { %1797 = dma.done.wait [#allocation8], 1024  }
  0x48   :  { %1798 = vsyncadd [#allocation8], 4294966272  ;;  %v1597_v0 = vld [vmem:[#allocation4 + $0x40] sm:$0xff]   ;;  %v1601_v4 = vld [vmem:[#allocation4 + $0x48] sm:$0xff]   ;;  %vm1806_vm0 = vmmov 0   ;;  %vm1255_vm1 = vcmask 15360  }
  0x49   :  { %v1598_v1 = vld [vmem:[#allocation4 + $0xc0] sm:$0xff]   ;;  %1385 = vmatprep.subr.bf16.mxu0 %v1597_v0  ;;  %v1602_v5 = vld [vmem:[#allocation4 + $0xc8] sm:$0xff]   ;;  %v1605_v8 = vld [vmem:[#allocation4 + $0x50] sm:$0xff]  }
  0x4a   :  { %v1599_v2 = vld [vmem:[#allocation4] sm:$0xff]   ;;  %1407 = vmatprep.subr.bf16.mxu1 %v1598_v1  ;;  %v1603_v6 = vld [vmem:[#allocation4 + $0x8] sm:$0xff]   ;;  %v1606_v9 = vld [vmem:[#allocation4 + $0xd0] sm:$0xff]  }
  0x4b   :  { %v1600_v3 = vld [vmem:[#allocation4 + $0x80] sm:$0xff]   ;;  %1386 = vmatpush3.bf16.msra.mxu0 %v1599_v2  ;;  %v1604_v7 = vld [vmem:[#allocation4 + $0x88] sm:$0xff]   ;;  %v1607_v10 = vld [vmem:[#allocation4 + $0x10] sm:$0xff]  }
  0x4c   :  { %1408 = vmatpush3.bf16.msra.mxu1 %v1600_v3  ;;  %1387 = vmatprep.subr.bf16.mxu0 %v1601_v4  ;;  %v1608_v11 = vld [vmem:[#allocation4 + $0x90] sm:$0xff]   ;;  %v1609_v12 = vld [vmem:[#allocation4 + $0x58] sm:$0xff]   ;;  %v1613_v16 = vld [vmem:[#allocation4 + $0x60] sm:$0xff]  }
  0x4d   :  { %1409 = vmatprep.subr.bf16.mxu1 %v1602_v5  ;;  %v1610_v13 = vld [vmem:[#allocation4 + $0xd8] sm:$0xff]   ;;  %v1614_v17 = vld [vmem:[#allocation4 + $0xe0] sm:$0xff]   ;;  %v1617_v20 = vld [vmem:[#allocation4 + $0x68] sm:$0xff]  }
  0x4e   :  { %v1611_v14 = vld [vmem:[#allocation4 + $0x18] sm:$0xff]   ;;  %v1615_v18 = vld [vmem:[#allocation4 + $0x20] sm:$0xff]   ;;  %v1618_v21 = vld [vmem:[#allocation4 + $0xe8] sm:$0xff]  }
  0x4f   :  { %1388 = vmatpush3.bf16.msra.mxu0 %v1603_v6  ;;  %v1612_v15 = vld [vmem:[#allocation4 + $0x98] sm:$0xff]   ;;  %v1616_v19 = vld [vmem:[#allocation4 + $0xa0] sm:$0xff]   ;;  %v1619_v22 = vld [vmem:[#allocation4 + $0x28] sm:$0xff]  }
  0x50   :  { %1410 = vmatpush3.bf16.msra.mxu1 %v1604_v7  ;;  %1389 = vmatprep.subr.bf16.mxu0 %v1605_v8  ;;  %v1620_v23 = vld [vmem:[#allocation4 + $0xa8] sm:$0xff]   ;;  %v1621_v24 = vld [vmem:[#allocation4 + $0x70] sm:$0xff]   ;;  %v1625_v28 = vld [vmem:[#allocation4 + $0x78] sm:$0xff]  }
  0x51   :  { %1411 = vmatprep.subr.bf16.mxu1 %v1606_v9  ;;  %v1622_v25 = vld [vmem:[#allocation4 + $0xf0] sm:$0xff]   ;;  %v1626_v29 = vld [vmem:[#allocation4 + $0xf8] sm:$0xff]   ;;  %v92_v32 = vld [vmem:[#allocation2] sm:$0xff] }
  0x52   :  { %v1623_v26 = vld [vmem:[#allocation4 + $0x30] sm:$0xff]   ;;  %v1627_v30 = vld [vmem:[#allocation4 + $0x38] sm:$0xff]   ;;  %v93_v33 = vld [vmem:[#allocation2 + $0x8] sm:$0xff]  ;;  %v1277_v34 = vcombine.low %v92_v32, %v92_v32  ;;  %v1278_v35 = vcombine.high %v92_v32, %v92_v32 }
  0x53   :  { %1390 = vmatpush3.bf16.msra.mxu0 %v1607_v10  ;;  %v1624_v27 = vld [vmem:[#allocation4 + $0xb0] sm:$0xff]   ;;  %v1628_v31 = vld [vmem:[#allocation4 + $0xb8] sm:$0xff]   ;;  %v1279_v36 = vcombine.low %v93_v33, %v93_v33  ;;  %v1280_v37 = vcombine.high %v93_v33, %v93_v33  ;;  %v1633_v38 = vld [vmem:[#allocation4 + $0x140] sm:$0xff]  }
  0x54   :  { %1412 = vmatpush3.bf16.msra.mxu1 %v1608_v11  ;;  %1391 = vmatprep.subr.bf16.mxu0 %v1609_v12  ;;  %v1634_v39 = vld [vmem:[#allocation4 + $0x1c0] sm:$0xff]   ;;  %v1637_v42 = vld [vmem:[#allocation4 + $0x148] sm:$0xff]   ;;  %v1641_v46 = vld [vmem:[#allocation4 + $0x150] sm:$0xff]  }
  0x55   :  { %1413 = vmatprep.subr.bf16.mxu1 %v1610_v13  ;;  %675 = vmatprep.mubr.bf16.mxu0 %v1278_v35  ;;  %v1635_v40 = vld [vmem:[#allocation4 + $0x100] sm:$0xff]   ;;  %v1638_v43 = vld [vmem:[#allocation4 + $0x1c8] sm:$0xff]   ;;  %v1642_v47 = vld [vmem:[#allocation4 + $0x1d0] sm:$0xff]   ;;  %v1805_v13 = vmov 0.0  }
  0x56   :  { %715 = vmatprep.mubr.bf16.mxu1 %v1280_v37  ;;  %v1636_v41 = vld [vmem:[#allocation4 + $0x180] sm:$0xff]   ;;  %v1639_v44 = vld [vmem:[#allocation4 + $0x108] sm:$0xff]   ;;  %v1643_v48 = vld [vmem:[#allocation4 + $0x110] sm:$0xff]  }
  0x57   :  { %1392 = vmatpush3.bf16.msra.mxu0 %v1611_v14  ;;  %v1640_v45 = vld [vmem:[#allocation4 + $0x188] sm:$0xff]   ;;  %v1644_v49 = vld [vmem:[#allocation4 + $0x190] sm:$0xff]   ;;  %v1645_v50 = vld [vmem:[#allocation4 + $0x158] sm:$0xff]  }
  0x58   :  { %1414 = vmatpush3.bf16.msra.mxu1 %v1612_v15  ;;  %1393 = vmatprep.subr.bf16.mxu0 %v1613_v16  ;;  %v1646_v51 = vld [vmem:[#allocation4 + $0x1d8] sm:$0xff]   ;;  %v1649_v54 = vld [vmem:[#allocation4 + $0x160] sm:$0xff]   ;;  %v1653_v58 = vld [vmem:[#allocation4 + $0x168] sm:$0xff]  }
  0x59   :  { %1415 = vmatprep.subr.bf16.mxu1 %v1614_v17  ;;  %v1647_v52 = vld [vmem:[#allocation4 + $0x118] sm:$0xff]   ;;  %v1650_v55 = vld [vmem:[#allocation4 + $0x1e0] sm:$0xff]   ;;  %v1654_v59 = vld [vmem:[#allocation4 + $0x1e8] sm:$0xff]  }
  0x5a   :  { %v1648_v53 = vld [vmem:[#allocation4 + $0x198] sm:$0xff]   ;;  %v1651_v56 = vld [vmem:[#allocation4 + $0x120] sm:$0xff]   ;;  %v1655_v60 = vld [vmem:[#allocation4 + $0x128] sm:$0xff]  }
  0x5b   :  { %1394 = vmatpush3.bf16.msra.mxu0 %v1615_v18  ;;  %v1652_v57 = vld [vmem:[#allocation4 + $0x1a0] sm:$0xff]   ;;  %v1656_v61 = vld [vmem:[#allocation4 + $0x1a8] sm:$0xff]   ;;  %v1657_v62 = vld [vmem:[#allocation4 + $0x170] sm:$0xff]  }
  0x5c   :  { %1416 = vmatpush3.bf16.msra.mxu1 %v1616_v19  ;;  %1395 = vmatprep.subr.bf16.mxu0 %v1617_v20  ;;  %v1658_v63 = vld [vmem:[#allocation4 + $0x1f0] sm:$0xff]   ;;  %v1661_v2 = vld [vmem:[#allocation4 + $0x178] sm:$0xff]   ;;  %v1669_v12 = vld [vmem:[%s2036_s3] sm:$0xff]  }
  0x5d   :  { %1417 = vmatprep.subr.bf16.mxu1 %v1618_v21  ;;  %v1659_v0 = vld [vmem:[#allocation4 + $0x130] sm:$0xff]   ;;  %v1662_v3 = vld [vmem:[#allocation4 + $0x1f8] sm:$0xff]   ;;  %v1670_v14 = vld [vmem:[%s2036_s3 + $0x8] sm:$0xff]  }
  0x5e   :  { %v1660_v1 = vld [vmem:[#allocation4 + $0x1b0] sm:$0xff]   ;;  %v1663_v4 = vld [vmem:[#allocation4 + $0x138] sm:$0xff]   ;;  %v1673_v17 = vld [vmem:[%s2036_s3 + $0x20] sm:$0xff]  }
  0x5f   :  { %1396 = vmatpush3.bf16.msra.mxu0 %v1619_v22  ;;  %v1664_v5 = vld [vmem:[#allocation4 + $0x1b8] sm:$0xff]   ;;  %v94_v6 = vld [vmem:[#allocation2 + $0x10] sm:$0xff]  ;;  %v1674_v18 = vld [vmem:[%s2036_s3 + $0x28] sm:$0xff]  }
  0x60   :  { %1418 = vmatpush3.bf16.msra.mxu1 %v1620_v23  ;;  %1397 = vmatprep.subr.bf16.mxu0 %v1621_v24  ;;  %v1281_v7 = vcombine.low %v94_v6, %v94_v6  ;;  %v1282_v8 = vcombine.high %v94_v6, %v94_v6  ;;  %v95_v9 = vld [vmem:[#allocation2 + $0x18] sm:$0xff]  ;;  %v1671_v15 = vld [vmem:[%s2036_s3 + $0x10] sm:$0xff]   ;;  %v1677_v21 = vld [vmem:[#allocation6] sm:$0xff]  }
  0x61   :  { %1419 = vmatprep.subr.bf16.mxu1 %v1622_v25  ;;  %v1283_v10 = vcombine.low %v95_v9, %v95_v9  ;;  %v1284_v11 = vcombine.high %v95_v9, %v95_v9  ;;  %v1672_v16 = vld [vmem:[%s2036_s3 + $0x18] sm:$0xff]   ;;  %v1675_v19 = vld [vmem:[%s2036_s3 + $0x30] sm:$0xff]   ;;  %v1678_v22 = vld [vmem:[#allocation6 + $0x8] sm:$0xff]  }
  0x62   :  { %v1676_v20 = vld [vmem:[%s2036_s3 + $0x38] sm:$0xff]   ;;  %v1679_v23 = vld [vmem:[#allocation6 + $0x10] sm:$0xff]   ;;  %v1681_v25 = vld [vmem:[#allocation6 + $0x20] sm:$0xff]  }
  0x63   :  { %1398 = vmatpush3.bf16.msra.mxu0 %v1623_v26  ;;  %v1680_v24 = vld [vmem:[#allocation6 + $0x18] sm:$0xff]   ;;  %v1682_v26 = vld [vmem:[#allocation6 + $0x28] sm:$0xff]   ;;  %v1691_v6 = vld [vmem:[#allocation7 + $0x30] sm:$0xff]  }
  0x64   :  { %1420 = vmatpush3.bf16.msra.mxu1 %v1624_v27  ;;  %1399 = vmatprep.subr.bf16.mxu0 %v1625_v28  ;;  %v1694_v9 = vld [vmem:[%s2042_s9 + $0x8] sm:$0xff]  }
  0x65   :  { %1421 = vmatprep.subr.bf16.mxu1 %v1626_v29  ;;  %v1276_v29 = vld [vmem:[%s2035_s2] ss:$0 sm:$0xff] }
  0x67   :  { %1400 = vmatpush3.bf16.msra.mxu0 %v1627_v30 }
  0x68   :  { %1422 = vmatpush3.bf16.msra.mxu1 %v1628_v31  ;;  %1429 = vmatprep.subr.bf16.mxu0 %v1633_v38 }
  0x69   :  { %1451 = vmatprep.subr.bf16.mxu1 %v1634_v39 }
  0x6a   :  { %676 = vmatmul.mubr.bf16.vlgmr.msra.gmra.mrb[0].mxu0 %v1277_v34 }
  0x6b   :  { %716 = vmatmul.mubr.bf16.vlgmr.msra.gmra.mrb[0].mxu1 %v1279_v36  ;;  %1430 = vmatpush3.bf16.msra.mxu0 %v1635_v40 }
  0x6c   :  { %1452 = vmatpush3.bf16.msra.mxu1 %v1636_v41  ;;  %1431 = vmatprep.subr.bf16.mxu0 %v1637_v42 }
  0x6d   :  { %1453 = vmatprep.subr.bf16.mxu1 %v1638_v43  ;;  %755 = vmatprep.mubr.bf16.mxu0 %v1282_v8  ;;  %v1693_v8 = vld [vmem:[%s2042_s9] sm:$0xff]  }
  0x6e   :  { %795 = vmatprep.mubr.bf16.mxu1 %v1284_v11  ;;  %v1696_v11 = vld [vmem:[%s2042_s9 + $0x18] sm:$0xff]  }
  0x6f   :  { %1432 = vmatpush3.bf16.msra.mxu0 %v1639_v44 }
  0x70   :  { %1454 = vmatpush3.bf16.msra.mxu1 %v1640_v45  ;;  %1433 = vmatprep.subr.bf16.mxu0 %v1641_v46 }
  0x71   :  { %1455 = vmatprep.subr.bf16.mxu1 %v1642_v47 }
  0x73   :  { %1434 = vmatpush3.bf16.msra.mxu0 %v1643_v48 }
  0x74   :  { %1456 = vmatpush3.bf16.msra.mxu1 %v1644_v49  ;;  %1435 = vmatprep.subr.bf16.mxu0 %v1645_v50 }
  0x75   :  { %1457 = vmatprep.subr.bf16.mxu1 %v1646_v51 }
  0x77   :  { %1436 = vmatpush3.bf16.msra.mxu0 %v1647_v52 }
  0x78   :  { %1458 = vmatpush3.bf16.msra.mxu1 %v1648_v53  ;;  %1437 = vmatprep.subr.bf16.mxu0 %v1649_v54  ;;  %v1683_v54 = vld [vmem:[#allocation6 + $0x30] sm:$0xff]  }
  0x79   :  { %1459 = vmatprep.subr.bf16.mxu1 %v1650_v55  ;;  %v1684_v55 = vld [vmem:[#allocation6 + $0x38] sm:$0xff]  }
  0x7b   :  { %1438 = vmatpush3.bf16.msra.mxu0 %v1651_v56  ;;  %v1685_v56 = vld [vmem:[#allocation7] sm:$0xff]  }
  0x7c   :  { %1460 = vmatpush3.bf16.msra.mxu1 %v1652_v57  ;;  %1439 = vmatprep.subr.bf16.mxu0 %v1653_v58  ;;  %v1686_v57 = vld [vmem:[#allocation7 + $0x8] sm:$0xff]   ;;  %v1687_v58 = vld [vmem:[#allocation7 + $0x10] sm:$0xff]  }
  0x7d   :  { %1461 = vmatprep.subr.bf16.mxu1 %v1654_v59  ;;  %v1688_v59 = vld [vmem:[#allocation7 + $0x18] sm:$0xff]  }
  0x7f   :  { %1440 = vmatpush3.bf16.msra.mxu0 %v1655_v60  ;;  %v1689_v60 = vld [vmem:[#allocation7 + $0x20] sm:$0xff]  }
  0x80   :  { %1462 = vmatpush3.bf16.msra.mxu1 %v1656_v61  ;;  %1441 = vmatprep.subr.bf16.mxu0 %v1657_v62  ;;  %v1690_v61 = vld [vmem:[#allocation7 + $0x28] sm:$0xff]   ;;  %v1349_v62 = vld [vmem:[%s2037_s4] ss:$0 sm:$0xff] }
  0x81   :  { %1463 = vmatprep.subr.bf16.mxu1 %v1658_v63 }
  0x83   :  { %1442 = vmatpush3.bf16.msra.mxu0 %v1659_v0 }
  0x84   :  { %1464 = vmatpush3.bf16.msra.mxu1 %v1660_v1  ;;  %1443 = vmatprep.subr.bf16.mxu0 %v1661_v2 }
  0x85   :  { %1465 = vmatprep.subr.bf16.mxu1 %v1662_v3 }
  0x87   :  { %1444 = vmatpush3.bf16.msra.mxu0 %v1663_v4 }
  0x88   :  { %1466 = vmatpush3.bf16.msra.mxu1 %v1664_v5  ;;  %1509 = vmatprep.subr.bf16.mxu0 %v1805_v13 }
  0x89   :  { %1529 = vmatprep.subr.bf16.mxu1 %v1805_v13 }
  0x8a   :  { %756 = vmatmul.mubr.bf16.vlgmr.msra.gmra.mrb[4].mxu0 %v1281_v7  ;;  %v1692_v7 = vld [vmem:[#allocation7 + $0x38] sm:$0xff]  }
  0x8b   :  { %796 = vmatmul.mubr.bf16.vlgmr.msra.gmra.mrb[4].mxu1 %v1283_v10  ;;  %1510 = vmatpush3.bf16.msra.mxu0 %v1669_v12  ;;  %v1695_v10 = vld [vmem:[%s2042_s9 + $0x10] sm:$0xff]   ;;  %v1697_v12 = vld [vmem:[%s2042_s9 + $0x20] sm:$0xff]  }
  0x8c   :  { %1511 = vmatprep.subr.bf16.mxu0 %v1805_v13  ;;  %1525 = vmatprep.mubr.msk.bf16.mxu0 %vm1806_vm0, %v1805_v13 }
  0x8d   :  { %1545 = vmatprep.mubr.msk.bf16.mxu1 %vm1806_vm0, %v1805_v13  ;;  %1530 = vmatpush3.bf16.msra.mxu1 %v1677_v21 }
  0x8e   :  { %1531 = vmatprep.subr.bf16.mxu1 %v1805_v13 }
  0x8f   :  { %1512 = vmatpush3.bf16.msra.mxu0 %v1670_v14  ;;  %v1698_v14 = vld [vmem:[%s2042_s9 + $0x28] sm:$0xff]  }
  0x90   :  { %1513 = vmatprep.subr.bf16.mxu0 %v1805_v13 }
  0x91   :  { %1532 = vmatpush3.bf16.msra.mxu1 %v1678_v22 }
  0x92   :  { %1533 = vmatprep.subr.bf16.mxu1 %v1805_v13 }
  0x93   :  { %1514 = vmatpush3.bf16.msra.mxu0 %v1671_v15  ;;  %v1358_v15 = vld [vmem:[%s2039_s6] ss:$0 sm:$0xff] }
  0x94   :  { %1515 = vmatprep.subr.bf16.mxu0 %v1805_v13 }
  0x95   :  { %1534 = vmatpush3.bf16.msra.mxu1 %v1679_v23  ;;  %v1699_v23 = vld [vmem:[%s2042_s9 + $0x30] sm:$0xff]  }
  0x96   :  { %1535 = vmatprep.subr.bf16.mxu1 %v1805_v13 }
  0x97   :  { %1516 = vmatpush3.bf16.msra.mxu0 %v1672_v16 }
  0x98   :  { %1517 = vmatprep.subr.bf16.mxu0 %v1805_v13 }
  0x99   :  { %1536 = vmatpush3.bf16.msra.mxu1 %v1680_v24  ;;  %v1700_v24 = vld [vmem:[%s2042_s9 + $0x38] sm:$0xff]  }
  0x9a   :  { %1537 = vmatprep.subr.bf16.mxu1 %v1805_v13 }
  0x9b   :  { %1518 = vmatpush3.bf16.msra.mxu0 %v1673_v17 }
  0x9c   :  { %1519 = vmatprep.subr.bf16.mxu0 %v1805_v13 }
  0x9d   :  { %1538 = vmatpush3.bf16.msra.mxu1 %v1681_v25  ;;  %v1367_v25 = vld [vmem:[%s2041_s8] ss:$0 sm:$0xff] }
  0x9e   :  { %1539 = vmatprep.subr.bf16.mxu1 %v1805_v13 }
  0x9f   :  { %1520 = vmatpush3.bf16.msra.mxu0 %v1674_v18 }
  0xa0   :  { %1521 = vmatprep.subr.bf16.mxu0 %v1805_v13 }
  0xa1   :  { %1540 = vmatpush3.bf16.msra.mxu1 %v1682_v26 }
  0xa2   :  { %1541 = vmatprep.subr.bf16.mxu1 %v1805_v13 }
  0xa3   :  { %1522 = vmatpush3.bf16.msra.mxu0 %v1675_v19 }
  0xa4   :  { %1523 = vmatprep.subr.bf16.mxu0 %v1805_v13 }
  0xa5   :  { %1542 = vmatpush3.bf16.msra.mxu1 %v1683_v54 }
  0xa6   :  { %1543 = vmatprep.subr.bf16.mxu1 %v1805_v13 }
  0xa7   :  { %1524 = vmatpush3.bf16.msra.mxu0 %v1676_v20 }
  0xa8   :  { %1549 = vmatprep.subr.bf16.mxu0 %v1805_v13 }
  0xa9   :  { %1544 = vmatpush3.bf16.msra.mxu1 %v1684_v55 }
  0xaa   :  { %1569 = vmatprep.subr.bf16.mxu1 %v1805_v13 }
 0x13d   :  { %v1401_v27 = vpop.f32.mrb[0].mxu0 }
 0x13e   :  { %v1423_v28 = vpop.f32.mrb[0].mxu1  ;;  %v1402_v30 = vpop.f32.mrb[1].mxu0 }
 0x13f   :  { %v1424_v31 = vpop.f32.mrb[1].mxu1  ;;  %v1403_v32 = vadd.f32 %v1402_v30, %v1401_v27  ;;  %v1404_v34 = vpop.f32.mrb[2].mxu0 }
 0x140   :  { %v1425_v33 = vadd.f32 %v1424_v31, %v1423_v28  ;;  %v1426_v35 = vpop.f32.mrb[2].mxu1  ;;  %v1405_v36 = vpop.f32.mrb[3].mxu0 }
 0x141   :  { %v1427_v37 = vpop.f32.mrb[3].mxu1  ;;  %v678_v38 = vadd.f32 %v1403_v32, %v1276_v29 }
 0x143   :  { %v718_v39 = vadd.f32 %v1425_v33, %v678_v38 }
 0x15d   :  { %v1445_v40 = vpop.f32.mrb[4].mxu0 }
 0x15e   :  { %v1467_v41 = vpop.f32.mrb[4].mxu1  ;;  %v1446_v42 = vpop.f32.mrb[5].mxu0 }
 0x15f   :  { %v1468_v43 = vpop.f32.mrb[5].mxu1  ;;  %v1447_v44 = vadd.f32 %v1446_v42, %v1445_v40  ;;  %v1448_v46 = vpop.f32.mrb[6].mxu0 }
 0x160   :  { %v1469_v45 = vadd.f32 %v1468_v43, %v1467_v41  ;;  %v1470_v47 = vpop.f32.mrb[6].mxu1  ;;  %v1449_v48 = vpop.f32.mrb[7].mxu0 }
 0x161   :  { %v1471_v49 = vpop.f32.mrb[7].mxu1  ;;  %v758_v50 = vadd.f32 %v1447_v44, %v718_v39 }
 0x163   :  { %v798_v51 = vadd.f32 %v1469_v45, %v758_v50 }
 0x165   :  { %v803_v52 = vmax.f32 %v798_v51, 0.0 }
 0x167   :  { %v804_v53 = vpack.c.bf16 %v803_v52, %v803_v52 }
 0x169   :  { %1526 = vmatmul.mubr.bf16.vlgmr.msra.gmra.mrb[8].mxu0 %v804_v53 }
 0x16a   :  { %1565 = vmatprep.mubr.msk.bf16.mxu0 %vm1806_vm0, %v1805_v13  ;;  %1550 = vmatpush3.bf16.msra.mxu0 %v1685_v56 }
 0x16b   :  { %1551 = vmatprep.subr.bf16.mxu0 %v1805_v13 }
 0x16e   :  { %1552 = vmatpush3.bf16.msra.mxu0 %v1686_v57 }
 0x16f   :  { %1553 = vmatprep.subr.bf16.mxu0 %v1805_v13 }
 0x172   :  { %1554 = vmatpush3.bf16.msra.mxu0 %v1687_v58 }
 0x173   :  { %1555 = vmatprep.subr.bf16.mxu0 %v1805_v13 }
 0x176   :  { %1556 = vmatpush3.bf16.msra.mxu0 %v1688_v59 }
 0x177   :  { %1557 = vmatprep.subr.bf16.mxu0 %v1805_v13 }
 0x17a   :  { %1558 = vmatpush3.bf16.msra.mxu0 %v1689_v60 }
 0x17b   :  { %1559 = vmatprep.subr.bf16.mxu0 %v1805_v13 }
 0x17e   :  { %1560 = vmatpush3.bf16.msra.mxu0 %v1690_v61 }
 0x17f   :  { %1561 = vmatprep.subr.bf16.mxu0 %v1805_v13 }
 0x182   :  { %1562 = vmatpush3.bf16.msra.mxu0 %v1691_v6 }
 0x183   :  { %1563 = vmatprep.subr.bf16.mxu0 %v1805_v13 }
 0x186   :  { %1564 = vmatpush3.bf16.msra.mxu0 %v1692_v7 }
 0x23c   :  { %v910_v63 = vpop.f32.mrb[8].mxu0 }
 0x23d   :  { %v911_v0 = vadd.f32 %v1349_v62, %v910_v63  ;;  %v1527_v1 = vpop.f32.mrb[9].mxu0 }
 0x23e   :  { %v913_v2 = vpop.f32.mrb[10].mxu0 }
 0x23f   :  { %v916_v3 = vmax.f32 %v911_v0, 0.0  ;;  %v1528_v4 = vpop.f32.mrb[11].mxu0 }
 0x241   :  { %v917_v5 = vpack.c.bf16 %v916_v3, %v916_v3 }
 0x243   :  { %1546 = vmatmul.mubr.bf16.vlgmr.msra.gmra.mrb[8].mxu1 %v917_v5 }
 0x244   :  { %1585 = vmatprep.mubr.msk.bf16.mxu1 %vm1806_vm0, %v1805_v13  ;;  %1570 = vmatpush3.bf16.msra.mxu1 %v1693_v8 }
 0x245   :  { %1571 = vmatprep.subr.bf16.mxu1 %v1805_v13 }
 0x248   :  { %1572 = vmatpush3.bf16.msra.mxu1 %v1694_v9 }
 0x249   :  { %1573 = vmatprep.subr.bf16.mxu1 %v1805_v13 }
 0x24c   :  { %1574 = vmatpush3.bf16.msra.mxu1 %v1695_v10 }
 0x24d   :  { %1575 = vmatprep.subr.bf16.mxu1 %v1805_v13 }
 0x250   :  { %1576 = vmatpush3.bf16.msra.mxu1 %v1696_v11 }
 0x251   :  { %1577 = vmatprep.subr.bf16.mxu1 %v1805_v13 }
 0x254   :  { %1578 = vmatpush3.bf16.msra.mxu1 %v1697_v12 }
 0x255   :  { %1579 = vmatprep.subr.bf16.mxu1 %v1805_v13 }
 0x258   :  { %1580 = vmatpush3.bf16.msra.mxu1 %v1698_v14 }
 0x259   :  { %1581 = vmatprep.subr.bf16.mxu1 %v1805_v13 }
 0x25c   :  { %1582 = vmatpush3.bf16.msra.mxu1 %v1699_v23 }
 0x25d   :  { %1583 = vmatprep.subr.bf16.mxu1 %v1805_v13  ;;  %v1376_v13 = vld [vmem:[%s2043_s10] ss:$0 sm:$0xff] }
 0x260   :  { %1584 = vmatpush3.bf16.msra.mxu1 %v1700_v24 }
 0x316   :  { %v1023_v16 = vpop.f32.mrb[8].mxu1 }
 0x317   :  { %v1024_v17 = vadd.f32 %v1358_v15, %v1023_v16  ;;  %v1547_v18 = vpop.f32.mrb[9].mxu1 }
 0x318   :  { %v1026_v19 = vpop.f32.mrb[10].mxu1 }
 0x319   :  { %v1029_v20 = vmax.f32 %v1024_v17, 0.0  ;;  %v1548_v21 = vpop.f32.mrb[11].mxu1 }
 0x31b   :  { %v1030_v22 = vpack.c.bf16 %v1029_v20, %v1029_v20 }
 0x31d   :  { %1566 = vmatmul.mubr.bf16.vlgmr.msra.gmra.mrb[12].mxu0 %v1030_v22 }
 0x3f0   :  { %v1136_v26 = vpop.f32.mrb[12].mxu0 }
 0x3f1   :  { %v1137_v27 = vadd.f32 %v1367_v25, %v1136_v26  ;;  %v1567_v28 = vpop.f32.mrb[13].mxu0 }
 0x3f2   :  { %v1139_v29 = vpop.f32.mrb[14].mxu0 }
 0x3f3   :  { %v1142_v30 = vmax.f32 %v1137_v27, 0.0  ;;  %v1568_v31 = vpop.f32.mrb[15].mxu0 }
 0x3f5   :  { %v1143_v32 = vpack.c.bf16 %v1142_v30, %v1142_v30 }
 0x3f7   :  { %1586 = vmatmul.mubr.bf16.vlgmr.msra.gmra.mrb[12].mxu1 %v1143_v32 }
 0x4ca   :  { %v1249_v33 = vpop.f32.mrb[12].mxu1 }
 0x4cb   :  { %v1250_v34 = vadd.f32 %v1376_v13, %v1249_v33  ;;  %v1587_v35 = vpop.f32.mrb[13].mxu1 }
 0x4cc   :  { %v1252_v36 = vpop.f32.mrb[14].mxu1 }
 0x4cd   :  { %v1588_v37 = vpop.f32.mrb[15].mxu1  ;;  %v1256_v38 = vsel %vm1255_vm1, %v1250_v34, -inf }
 0x4ce   :  { %1257 = vmax.xlane.f32.xlu0 %v1256_v38 }
 0x55b   :  { %v1258_v39 = vpop.xlane.xlu0 %1257 }
 0x55c   :  { %v1259_v40 = vsub.f32 %v1250_v34, %v1258_v39 }
 0x55e   :  { %v1260_v41 = vmul.f32 1.442695, %v1259_v40 }
 0x560   :  { %1701 = vpow2.f32 %v1260_v41 }
 0x56a   :  { %v1702_v42 = vpop.eup %1701 }
 0x56b   :  { %v1262_v43 = vsel %vm1255_vm1, %v1702_v42, 0.0 }
 0x56c   :  { %1263 = vadd.xlane.f32.xlu0 %v1262_v43 }
 0x5f9   :  { %v1264_v44 = vpop.xlane.xlu0 %1263 }
 0x5fa   :  { %1703 = vlog2.f32 %v1264_v44 }
 0x604   :  { %v1704_v45 = vpop.eup %1703 }
 0x605   :  { %v1266_v46 = vmul.f32 0.6931472, %v1704_v45 }
 0x607   :  { %v1267_v47 = vsub.f32 %v1259_v40, %v1266_v46 }
 0x609   :  { %1268 = vst.msk [vmem:[%s2044_s11] sm:$0xff] %vm1255_vm1, %v1267_v47 }
 0x60a   :  { %1273 = vsyncpa [#allocation3], 1 }
 0x60b   :  { %1274 = vsyncpa [#allocation5], 1 }
 0x60c   :  { %1275 = vsyncpa [#allocation8], 1 }

</bundles_post_ra>
